<compile_context>
chip_gen: v5e
topology: v5e:2x2
jax: 0.10.0
libtpu: 0.0.40
codegen_flags: <defaults>
</compile_context>

<pallas_src>
import functools
import math

import jax
import jax.numpy as jnp
from jax.experimental import pallas as pl
from jax.experimental.pallas import tpu as pltpu

_LANE = 128


def _round_up(x, m):
    return (x + m - 1) // m * m


def _sublane_for(itemsize):
    # Packed sub-32-bit dtypes travel in sublane groups; round row tiles to it.
    return {4: 8, 2: 16, 1: 32}.get(itemsize, 8)


def _block_budget_bytes():
    # 8 MiB blocks on 128 MiB-VMEM parts (v5e/v6e), 4 MiB on 64 MiB (v7x).
    try:
        info = pltpu.get_tpu_info()
        vmem = getattr(info, "vmem_capacity_bytes", 64 * 1024 * 1024)
    except Exception:  # conservative fallback
        vmem = 64 * 1024 * 1024
    return (8 if vmem >= 128 * 1024 * 1024 else 4) * 1024 * 1024


def _choose_tiles(rows, lanes, itemsize, sublane):
    """Pick (tr, tl) for a (rows, lanes) 2-D elementwise stream."""
    budget_elems = _block_budget_bytes() // itemsize
    lanes_pad = _round_up(lanes, _LANE)
    rows_pad = _round_up(rows, sublane)

    if rows_pad * lanes_pad <= budget_elems:
        # Whole array fits in one block.
        tr, tl = rows_pad, lanes
    elif sublane * lanes_pad <= budget_elems:
        # Full lane extent fits: keep tl == lanes (fully contiguous HBM spans)
        # and tile rows only.
        tl = lanes
        tr = max(sublane, (budget_elems // lanes_pad) // sublane * sublane)
    else:
        # Very large lane extent: tile both, keeping the lane tile large and
        # 128-aligned (never fall back to narrow strided 128-lane DMAs).
        tr = min(rows_pad, 4 * sublane)
        tl = max(_LANE, min(lanes_pad, (budget_elems // tr) // _LANE * _LANE))
    return tr, tl


def _ensure_two_blocks(rows, lanes, tr, tl, sublane, itemsize):
    """>= 2 grid blocks so v7x's two TensorCores can split 'parallel' axes."""
    if rows * lanes * itemsize < (1 << 20):  # tiny tensors: not worth it
        return tr, tl

    def nblk(a, b):
        return pl.cdiv(rows, a) * pl.cdiv(lanes, b)

    while nblk(tr, tl) < 2 and tr > sublane:
        tr = max(sublane, (tr // 2) // sublane * sublane)
    if nblk(tr, tl) < 2 and lanes >= 2 * _LANE:
        tl = max(_LANE, _round_up(pl.cdiv(lanes, 2), _LANE))
    return tr, tl


def _fused_leaky_relu_kernel(x_ref, b_ref, o_ref, *, pos_scale, neg_scale):
    # x block: (tr, tl); bias block: (tr, 1) or (1, tl) -> broadcasts.
    x = x_ref[...]
    y = x + b_ref[...]
    pos = jnp.asarray(pos_scale, dtype=y.dtype)
    neg = jnp.asarray(neg_scale, dtype=y.dtype)
    o_ref[...] = (y * jnp.where(y >= 0, pos, neg)).astype(o_ref.dtype)


def fused_leaky_relu(x, bias, negative_slope=0.2, scale=math.sqrt(2.0)):
    """x: (N, C, H, W), bias: (C,) -> leaky_relu(x + bias) * scale."""
    N, C, H, W = x.shape
    HW = H * W
    itemsize = jnp.dtype(x.dtype).itemsize
    sublane = _sublane_for(itemsize)
    bias = bias.astype(x.dtype)

    if HW >= _LANE:
        # Layout A: rows = (n, c) pairs -> sublanes, flattened spatial -> lanes.
        rows, lanes = N * C, HW
        x2 = x.reshape(rows, lanes)
        b2 = jnp.tile(bias, N).reshape(rows, 1)       # per-row bias column
        bias_is_column = True
    else:
        # Layout B (tiny feature maps): rows = batch, lanes = C*H*W, keeping a
        # wide lane axis so stores stay lane-dense.
        rows, lanes = N, C * HW
        x2 = x.reshape(rows, lanes)
        b2 = jnp.repeat(bias, HW).reshape(1, lanes)   # per-lane bias pattern
        bias_is_column = False

    tr, tl = _choose_tiles(rows, lanes, itemsize, sublane)
    tr, tl = _ensure_two_blocks(rows, lanes, tr, tl, sublane, itemsize)
    grid = (pl.cdiv(rows, tr), pl.cdiv(lanes, tl))

    if bias_is_column:
        b_spec = pl.BlockSpec((tr, 1), lambda r, l: (r, 0))
    else:
        b_spec = pl.BlockSpec((1, tl), lambda r, l: (0, l))

    # VMEM limit sized to the actual double-buffered working set (+ slack):
    # ~24 MiB for 4 MiB blocks (v7x), ~40 MiB for 8 MiB blocks (v5e/v6e).
    block_bytes = _round_up(tr, sublane) * _round_up(tl, _LANE) * itemsize
    bias_bytes = (_round_up(tr, sublane) if bias_is_column else _round_up(tl, _LANE)) * itemsize
    working = 2 * (2 * block_bytes + bias_bytes)
    vmem_limit = int(min(100 << 20, max(16 << 20, working + (8 << 20))))

    kernel = functools.partial(
        _fused_leaky_relu_kernel,
        pos_scale=float(scale),
        neg_scale=float(negative_slope) * float(scale),
    )

    out2 = pl.pallas_call(
        kernel,
        out_shape=jax.ShapeDtypeStruct((rows, lanes), x.dtype),
        grid_spec=pltpu.PrefetchScalarGridSpec(
            num_scalar_prefetch=0,
            grid=grid,
            in_specs=[
                pl.BlockSpec((tr, tl), lambda r, l: (r, l)),
                b_spec,
            ],
            out_specs=pl.BlockSpec((tr, tl), lambda r, l: (r, l)),
        ),
        compiler_params=pltpu.CompilerParams(
            dimension_semantics=("parallel", "parallel"),
            vmem_limit_bytes=vmem_limit,
        ),
        cost_estimate=pl.CostEstimate(
            flops=3 * rows * lanes,
            transcendentals=0,
            bytes_accessed=2 * rows * lanes * itemsize,
        ),
    )(x2, b2)

    return out2.reshape(N, C, H, W)


class FusedLeakyReLU:
    """JAX/Pallas equivalent of the PyTorch FusedLeakyReLU module (forward only)."""

    def __init__(self, channel, negative_slope=0.2, scale=math.sqrt(2.0)):
        # nn.Parameter(torch.zeros(channel)) -> deterministic zero init
        self.bias = jnp.zeros((channel,), dtype=jnp.float32)
        self.negative_slope = negative_slope
        self.scale = scale

    def __call__(self, x):
        return fused_leaky_relu(x, self.bias, self.negative_slope, self.scale)


# TODO(synk): CUDA autograd backward (FusedLeakyReLUFunctionBackward) not ported;
# forward matches the PyTorch CPU/reference path exactly.


def _reference(x, bias, negative_slope, scale):
    C = bias.shape[0]
    y = x + bias.reshape(1, C, 1, 1)
    return jnp.where(y >= 0, y, y * negative_slope) * scale


if __name__ == "__main__":
    key = jax.random.PRNGKey(0)
    kx, kb = jax.random.split(key)

    # Primary small test (module-consistent shapes): batch=2, channels=4, 16x16.
    N, C, H, W = 2, 4, 16, 16
    x = jax.random.normal(kx, (N, C, H, W), dtype=jnp.float32)

    module = FusedLeakyReLU(C)
    module.bias = jax.random.normal(kb, (C,), dtype=jnp.float32)  # non-trivial bias

    out = jax.block_until_ready(module(x))
    ref = _reference(x, module.bias, module.negative_slope, module.scale)
    assert out.shape == (N, C, H, W)
    assert jnp.allclose(out, ref, atol=1e-6, rtol=1e-6)

    # Unaligned shapes: HW < 128 and rows not a multiple of 8 -> layout B path
    # with ragged (masked) edge blocks, no wrapper-side padding.
    kx2, kb2 = jax.random.split(kb)
    x_small = jax.random.normal(kx2, (1, 3, 7, 7), dtype=jnp.float32)
    b_small = jax.random.normal(kb2, (3,), dtype=jnp.float32)
    out_small = jax.block_until_ready(fused_leaky_relu(x_small, b_small))
    assert out_small.shape == (1, 3, 7, 7)
    assert jnp.allclose(out_small, _reference(x_small, b_small, 0.2, math.sqrt(2.0)),
                        atol=1e-6, rtol=1e-6)

    # bf16 path exercises the dtype-aware sublane rounding.
    xb = x.astype(jnp.bfloat16)
    bb = module.bias.astype(jnp.bfloat16)
    out_bf = jax.block_until_ready(fused_leaky_relu(xb, bb))
    ref_bf = _reference(xb, bb, 0.2, math.sqrt(2.0))
    assert out_bf.shape == (N, C, H, W)
    assert jnp.allclose(out_bf.astype(jnp.float32), ref_bf.astype(jnp.float32),
                        atol=5e-2, rtol=5e-2)

    print("KERNEL_OK")
</pallas_src>

<mosaic_0001>
module attributes {stable_mosaic.version = 11 : i64} {
  func.func @_fused_leaky_relu_kernel(%arg0: i32, %arg1: i32, %arg2: memref<8x256xf32, #tpu.memory_space<vmem>>, %arg3: memref<8x1xf32, #tpu.memory_space<vmem>>, %arg4: memref<8x256xf32, #tpu.memory_space<vmem>>) attributes {dimension_semantics = [#tpu.dimension_semantics<parallel>, #tpu.dimension_semantics<parallel>], iteration_bounds = array<i64: 1, 1>, scalar_prefetch = 0 : i64, scratch_operands = 0 : i64, tpu.core_type = #tpu.core_type<tc>, window_params = [{transform_indices = @transform_0, window_bounds = array<i64: 8, 256>}, {transform_indices = @transform_1, window_bounds = array<i64: 8, 1>}, {transform_indices = @transform_2, window_bounds = array<i64: 8, 256>}]} {
    %c0 = arith.constant 0 : index
    %c0_0 = arith.constant 0 : index
    %0 = vector.load %arg2[%c0, %c0_0] : memref<8x256xf32, #tpu.memory_space<vmem>>, vector<8x256xf32>
    %c0_1 = arith.constant 0 : index
    %c0_2 = arith.constant 0 : index
    %1 = vector.load %arg3[%c0_1, %c0_2] : memref<8x1xf32, #tpu.memory_space<vmem>>, vector<8x1xf32>
    %2 = vector.broadcast %1 : vector<8x1xf32> to vector<8x256xf32>
    %3 = arith.addf %0, %2 : vector<8x256xf32>
    %cst = arith.constant 0.000000e+00 : f32
    %4 = vector.broadcast %cst : f32 to vector<8x256xf32>
    %5 = arith.cmpf oge, %3, %4 : vector<8x256xf32>
    %cst_3 = arith.constant 1.41421354 : f32
    %cst_4 = arith.constant 0.282842726 : f32
    %6 = vector.broadcast %cst_3 : f32 to vector<8x256xf32>
    %7 = vector.broadcast %cst_4 : f32 to vector<8x256xf32>
    %8 = arith.select %5, %6, %7 : vector<8x256xi1>, vector<8x256xf32>
    %9 = arith.mulf %3, %8 : vector<8x256xf32>
    %c0_5 = arith.constant 0 : index
    %c0_6 = arith.constant 0 : index
    %10 = vector.load %arg4[%c0_5, %c0_6] : memref<8x256xf32, #tpu.memory_space<vmem>>, vector<8x256xf32>
    tpu.vector_store %arg4[%c0_5, %c0_6], %9 {strides = array<i32>} : memref<8x256xf32, #tpu.memory_space<vmem>>, vector<8x256xf32>,
    return
  }
  func.func @transform_0(%arg0: i32, %arg1: i32) -> (i32, i32) {
    %c0_i32 = arith.constant 0 : i32
    return %arg0, %arg1 : i32, i32
  }
  func.func @transform_1(%arg0: i32, %arg1: i32) -> (i32, i32) {
    %c0_i32 = arith.constant 0 : i32
    %c0_i32_0 = arith.constant 0 : i32
    return %arg0, %c0_i32 : i32, i32
  }
  func.func @transform_2(%arg0: i32, %arg1: i32) -> (i32, i32) {
    %c0_i32 = arith.constant 0 : i32
    return %arg0, %arg1 : i32, i32
  }
}

</mosaic_0001>

<bundles_post_ra>
// kernel: tpu_custom_call.1
= control target key start
LH: loop header
LB: loop body
LE: loop exit
PB: predicated region body
PF: predicated region fallthrough
CT: control target
= control target key end

     0   :  { %7 = vsyncpa [#allocation3], 0  ;;  %s146_s0 = inlined_call_operand.hbm [shape: f32[8,256], index: 0, kind: input, shape index: {}]   ;;  %s147_s1 = inlined_call_operand.vmem [shape: f32[8,1], index: 1, kind: input, shape index: {}]   ;;  %s148_s2 = inlined_call_operand.hbm [shape: f32[8,256], index: 2, kind: output, shape index: {}]  }
   0x1   :  { %8 = vsyncpa [#allocation4], 0  ;;  %s14_s11 = sshll.u32 %s146_s0, 4  ;;  %s118_s12 = smov [#allocation2]   ;;  %s15_s11 = int_to_ptr.hbm [resolvable:$true] %s14_s11 }
   0x2   :  { %s16_s13 = sshll.u32 %s118_s12, 4  ;;  %s17_s13 = int_to_ptr.vmem [resolvable:$true] %s16_s13 }
   0x3   :  { %19 = dma.hbm_to_vmem [thread:$0]  %s15_s11, 256, %s17_s13, [#allocation3]  }
   0x4   :  { %114 = dma.done.wait [#allocation3], 256  }
   0x5   :  { %115 = vsyncadd [#allocation3], 4294967040  ;;  %v119_v0 = vmov 0   ;;  %v28_v1 = vld [vmem:[%s147_s1] sm:$0xff]  ;;  %v27_v3 = vld [vmem:[#allocation2 + $0x8] sm:$0xff]  ;;  %s120_s0 = smov [#allocation5]  }
   0x6   :  { %65 = vset.pattern.permute.xlu0 %v119_v0  ;;  %v26_v2 = vld [vmem:[#allocation2] sm:$0xff]  ;;  %s49_s16 = sshll.u32 %s120_s0, 4  ;;  %s51_s19 = sshll.u32 %s148_s2, 4  ;;  %v121_v7 = vmov 0.28284273   ;;  %s50_s16 = int_to_ptr.vmem [resolvable:$true] %s49_s16  ;;  %s52_s19 = int_to_ptr.hbm [resolvable:$true] %s51_s19 }
   0x7   :  { %31 = vperm.xlu0 %65, %v28_v1  }
  0x79   :  { %v32_v4 = vpop.permute.xlu0 %31 }
  0x7a   :  { %v34_v5 = vadd.f32 %v32_v4, %v26_v2  ;;  %v35_v6 = vadd.f32 %v32_v4, %v27_v3 }
  0x7c   :  { %vm36_vm0 = vcmp.ge.f32.partialorder %v34_v5, 0.0  ;;  %vm37_vm1 = vcmp.ge.f32.partialorder %v35_v6, 0.0 }
  0x7d   :  { %v38_v8 = vsel %vm36_vm0, 1.4142135, %v121_v7  ;;  %v39_v9 = vsel %vm37_vm1, 1.4142135, %v121_v7 }
  0x7e   :  { %v40_v10 = vmul.f32 %v38_v8, %v34_v5  ;;  %v41_v11 = vmul.f32 %v39_v9, %v35_v6 }
  0x80   :  { %42 = vst [vmem:[#allocation5] sm:$0xff] %v40_v10 }
  0x81   :  { %43 = vst [vmem:[#allocation5 + $0x8] sm:$0xff] %v41_v11 }
  0x82   :  { %54 = dma.vmem_to_hbm [thread:$0]  %s50_s16, 256, %s52_s19, [#allocation4]  }
  0x83   :  { %116 = dma.done.wait [#allocation4], 256  }
  0x84   :  { %117 = vsyncadd [#allocation4], 4294967040 }
  0x85   :  { %59 = vsyncpa [#allocation3], 1 }
  0x86   :  { %60 = vsyncpa [#allocation4], 1 }

</bundles_post_ra>
